<compile_context>
chip_gen: v6e
topology: v6e:2x2x1
jax: 0.10.0
libtpu: 0.0.40
codegen_flags: <defaults>
</compile_context>

<pallas_src>
import numpy as np
import jax
import jax.numpy as jnp
from jax.experimental import pallas as pl
from jax.experimental.pallas import tpu as pltpu


def _round_up(x, m):
    return ((x + m - 1) // m) * m


def _dynamicor_kernel(x_ref, c_ref, out_ref):
    # x_ref : (3, Npad, TB)  channels [p, u0, u1]; sublanes = contour pts, lanes = batch
    # c_ref : (Npad, 8) f32  cols = [Gx, Gy, tvx*itd, tvy*itd, Hx, Hy, 0, 0]
    #                        (zero rows in the sublane padding keep the sums exact)
    # out_ref: (2, TB)  f32  rows = [Fy, Fx]  (lane-dense output)
    p = x_ref[0].astype(jnp.float32)          # (Npad, TB)
    u0 = x_ref[1].astype(jnp.float32)
    u1 = x_ref[2].astype(jnp.float32)

    gx = c_ref[:, 0:1]                        # (Npad, 1) -> broadcast along lanes (batch)
    gy = c_ref[:, 1:2]
    tvx = c_ref[:, 2:3]
    tvy = c_ref[:, 3:4]
    hx = c_ref[:, 4:5]
    hy = c_ref[:, 5:6]

    # wall shear stress: tau = (u . T) * miu / (|T| * delta)   (itd pre-folded)
    tau = u0 * tvx + u1 * tvy                 # (Npad, TB)

    # pressure (-0.5 neighbour avg folded into Gx/Gy) + viscous (+0.5 into Hx/Hy)
    # sublane reduce over the contour axis -> (1, TB) lane-dense rows; direct
    # row stores, no concatenate.
    out_ref[0:1, :] = jnp.sum(p * gy + tau * hy, axis=0, keepdims=True)   # Fy
    out_ref[1:2, :] = jnp.sum(p * gx + tau * hx, axis=0, keepdims=True)   # Fx


class DynamicorPallas:
    """JAX/Pallas port of Dynamicor. coords: (N, 2, 2) float array."""

    def __init__(self, coords, use_bf16_fields=False,
                 vmem_budget_bytes=12 * 1024 * 1024):
        self.c, self.rho, self.uinf = 1.0, 1.0, 1.0
        self.Re = 250
        self.miu = self.c * self.rho * self.uinf / self.Re
        self.pack_dtype = jnp.bfloat16 if use_bf16_fields else jnp.float32
        self._itemsize = 2 if use_bf16_fields else 4
        self._vmem_budget = int(vmem_budget_bytes)

        coords = np.asarray(coords, np.float32)                 # (N, 2, 2)
        N = coords.shape[0]
        self.N = N
        sub = 16 if use_bf16_fields else 8                      # sublane multiple
        self.Npad = _round_up(N, sub)

        pts = coords[:, 0, :]                                   # surface points
        T = np.roll(pts, -1, axis=0) - pts                      # T_vector (ind2 - ind1)
        Nv = np.stack([T[:, 1], -T[:, 0]], axis=-1)             # T @ [[0,-1],[1,0]]
        T_norm = np.linalg.norm(T, axis=-1)
        N_norm = np.linalg.norm(Nv, axis=-1)
        delta = np.linalg.norm(coords[:, 0] - coords[:, 1], axis=-1)
        assert np.all(T_norm > 0.0) and np.all(delta > 0.0), "degenerate contour"

        cx = T_norm * Nv[:, 0] / N_norm
        cy = T_norm * Nv[:, 1] / N_norm
        itd = self.miu / (T_norm * delta)

        # One (Npad, 8) coefficient slab; constants folded in; padded rows = 0.
        coef = np.zeros((self.Npad, 8), np.float32)
        coef[:N, 0] = -0.5 * (cx + np.roll(cx, 1))              # Gx
        coef[:N, 1] = -0.5 * (cy + np.roll(cy, 1))              # Gy
        coef[:N, 2] = T[:, 0] * itd                             # tvx * itd
        coef[:N, 3] = T[:, 1] * itd                             # tvy * itd
        coef[:N, 4] = 0.5 * (T[:, 0] + np.roll(T[:, 0], 1))     # Hx
        coef[:N, 5] = 0.5 * (T[:, 1] + np.roll(T[:, 1], 1))     # Hy
        self.coef = jnp.asarray(coef)

        self._jit_forward = jax.jit(self._forward)

    # ---- batch tile selection (lane axis) --------------------------------
    def _pick_tb(self, B):
        if B <= 128:
            return B                       # single full-dim lane block
        # VMEM cap: double-buffered field block = 2 * 3 * Npad * TB * itemsize.
        cap = (self._vmem_budget // (2 * 3 * self.Npad * self._itemsize))
        cap = max(128, (cap // 128) * 128)
        # >=2 grid steps (megacore on v7x + pipelining), blocks of <=512 rows.
        steps = max(2, pl.cdiv(B, 512))
        tb = _round_up(pl.cdiv(B, steps), 128)
        return min(tb, cap)

    # ---- forward ----------------------------------------------------------
    def _forward(self, fields):
        B, N = fields.shape[0], fields.shape[1]
        assert N == self.N

        # Single fused extraction: (B,N) channel picks -> (3, Npad, B) slab
        # (contour on sublanes, batch on lanes).  With allow_input_fusion this
        # producer fuses into the pallas_call operand instead of hitting HBM.
        packed = jnp.stack([fields[:, :, 0, 0],
                            fields[:, :, 1, 1],
                            fields[:, :, 1, 2]], axis=0)         # (3, B, N)
        packed = packed.astype(self.pack_dtype).transpose(0, 2, 1)  # (3, N, B)
        if self.Npad != N:
            packed = jnp.pad(packed, ((0, 0), (0, self.Npad - N), (0, 0)))

        TB = self._pick_tb(B)
        grid = (pl.cdiv(B, TB),)

        fyfx = pl.pallas_call(
            _dynamicor_kernel,
            out_shape=jax.ShapeDtypeStruct((2, B), jnp.float32),
            grid=grid,
            in_specs=[
                pl.BlockSpec((3, self.Npad, TB), lambda i: (0, 0, i)),  # field slab
                pl.BlockSpec((self.Npad, 8), lambda i: (0, 0)),         # coefficients
            ],
            out_specs=pl.BlockSpec((2, TB), lambda i: (0, i)),          # lane-dense
            compiler_params=pltpu.CompilerParams(
                dimension_semantics=("parallel",),       # megacore sharding on v7x
                allow_input_fusion=[True, False],        # fuse the pack producer
            ),
        )(packed, self.coef)

        # (2, B) rows [Fy, Fx] -> (B, 4) = [Fy, Fx, CL, CD]; CL=2*Fy, CD=2*Fx.
        fyfx_t = fyfx.T
        return jnp.concatenate([fyfx_t, 2.0 * fyfx_t], axis=-1)

    def __call__(self, fields):
        return self._jit_forward(jnp.asarray(fields, jnp.float32))


def _reference_forward(coords, fields):
    """Direct pure-JAX port of the PyTorch forward for verification."""
    coords = jnp.asarray(coords, jnp.float32)
    fields = jnp.asarray(fields, jnp.float32)
    N = coords.shape[0]
    miu = 1.0 / 250.0
    ind2 = (jnp.arange(N) + 1) % N
    T = coords[ind2, 0, :] - coords[:, 0, :]
    Nv = jnp.stack([T[:, 1], -T[:, 0]], axis=-1)
    T_norm = jnp.linalg.norm(T, axis=-1)
    N_norm = jnp.linalg.norm(Nv, axis=-1)
    delta = jnp.linalg.norm(coords[:, 0] - coords[:, 1], axis=-1)
    p = fields[:, :, 0, 0]
    p_ave = (p + p[:, ind2]) / 2.0
    Ft_n = p_ave * T_norm
    Fx = -Ft_n * Nv[:, 0] / N_norm
    Fy = -Ft_n * Nv[:, 1] / N_norm
    u = fields[:, :, 1, 1:]
    du = (u[:, :, 0] * T[:, 0] + u[:, :, 1] * T[:, 1]) / T_norm
    tau = du / delta * miu
    tau_ave = (tau + tau[:, ind2]) * 0.5
    T_n = tau_ave * T_norm
    Tx = T_n * T[:, 0] / T_norm
    Ty = T_n * T[:, 1] / T_norm
    Fx, Fy = jnp.sum(Fx, 1) + jnp.sum(Tx, 1), jnp.sum(Fy, 1) + jnp.sum(Ty, 1)
    CL, CD = Fy / 0.5, Fx / 0.5
    return jnp.stack((Fy, Fx, CL, CD), axis=-1)


if __name__ == "__main__":
    C, W = 2, 3

    def make_coords(n):
        # Deterministic synthetic contour: n surface points on a circle
        # (radius 0.5) plus a matching inner ring (radius 0.45) for delta.
        theta = np.linspace(0.0, 2.0 * np.pi, n, endpoint=False)
        surf = 0.50 * np.stack([np.cos(theta), np.sin(theta)], axis=-1)
        inner = 0.45 * np.stack([np.cos(theta), np.sin(theta)], axis=-1)
        return np.stack([surf, inner], axis=1).astype(np.float32)   # (n, 2, 2)

    key = jax.random.PRNGKey(0)
    k1, k2 = jax.random.split(key)

    # Case 1: small batch (single full-dim lane block); contour length 84 is
    # NOT a multiple of 8, exercising the zero-padded sublane tail.
    N1, B1 = 84, 2
    coords = make_coords(N1)
    fields1 = jax.random.normal(k1, (B1, N1, C, W), dtype=jnp.float32)
    model = DynamicorPallas(coords)
    out1 = jax.block_until_ready(model(fields1))
    ref1 = _reference_forward(coords, fields1)
    np.testing.assert_allclose(np.asarray(out1), np.asarray(ref1),
                               rtol=1e-4, atol=1e-5)

    # Case 2: batch > 128 -> TB=128, grid=(2,) ("parallel" => both v7x cores),
    # with a partial final block (130 % 128 != 0) exercising masked writeback.
    B2 = 130
    fields2 = jax.random.normal(k2, (B2, N1, C, W), dtype=jnp.float32)
    out2 = jax.block_until_ready(model(fields2))
    ref2 = _reference_forward(coords, fields2)
    np.testing.assert_allclose(np.asarray(out2), np.asarray(ref2),
                               rtol=1e-4, atol=1e-5)

    # Case 3: optional bf16 field packing (halves dominant HBM traffic on
    # v6e/v7x); accumulation stays f32 in-kernel -> only input rounding error.
    model_bf16 = DynamicorPallas(coords, use_bf16_fields=True)
    out3 = jax.block_until_ready(model_bf16(fields2))
    np.testing.assert_allclose(np.asarray(out3), np.asarray(ref2),
                               rtol=5e-2, atol=5e-2)

    print("KERNEL_OK")
</pallas_src>

<mosaic_0001>
module attributes {stable_mosaic.version = 11 : i64} {
  func.func @_dynamicor_kernel(%arg0: i32, %arg1: memref<3x88x2xf32, #tpu.memory_space<vmem>>, %arg2: memref<88x8xf32, #tpu.memory_space<vmem>>, %arg3: memref<2x2xf32, #tpu.memory_space<vmem>>) attributes {dimension_semantics = [#tpu.dimension_semantics<parallel>], iteration_bounds = array<i64: 1>, scalar_prefetch = 0 : i64, scratch_operands = 0 : i64, tpu.core_type = #tpu.core_type<tc>, window_params = [{transform_indices = @transform_0, window_bounds = array<i64: 3, 88, 2>}, {pipeline_mode = #tpu.pipeline_mode<synchronous>, transform_indices = @transform_1, window_bounds = array<i64: 88, 8>}, {transform_indices = @transform_2, window_bounds = array<i64: 2, 2>}]} {
    %c0 = arith.constant 0 : index
    %c0_0 = arith.constant 0 : index
    %c0_1 = arith.constant 0 : index
    %0 = vector.load %arg1[%c0, %c0_0, %c0_1] : memref<3x88x2xf32, #tpu.memory_space<vmem>>, vector<1x88x2xf32>
    %1 = vector.shape_cast %0 : vector<1x88x2xf32> to vector<88x2xf32>
    %c1 = arith.constant 1 : index
    %c0_2 = arith.constant 0 : index
    %c0_3 = arith.constant 0 : index
    %2 = vector.load %arg1[%c1, %c0_2, %c0_3] : memref<3x88x2xf32, #tpu.memory_space<vmem>>, vector<1x88x2xf32>
    %3 = vector.shape_cast %2 : vector<1x88x2xf32> to vector<88x2xf32>
    %c2 = arith.constant 2 : index
    %c0_4 = arith.constant 0 : index
    %c0_5 = arith.constant 0 : index
    %4 = vector.load %arg1[%c2, %c0_4, %c0_5] : memref<3x88x2xf32, #tpu.memory_space<vmem>>, vector<1x88x2xf32>
    %5 = vector.shape_cast %4 : vector<1x88x2xf32> to vector<88x2xf32>
    %c0_6 = arith.constant 0 : index
    %c0_7 = arith.constant 0 : index
    %6 = vector.load %arg2[%c0_6, %c0_7] : memref<88x8xf32, #tpu.memory_space<vmem>>, vector<88x1xf32>
    %c0_8 = arith.constant 0 : index
    %c1_9 = arith.constant 1 : index
    %7 = vector.load %arg2[%c0_8, %c1_9] : memref<88x8xf32, #tpu.memory_space<vmem>>, vector<88x1xf32>
    %c0_10 = arith.constant 0 : index
    %c2_11 = arith.constant 2 : index
    %8 = vector.load %arg2[%c0_10, %c2_11] : memref<88x8xf32, #tpu.memory_space<vmem>>, vector<88x1xf32>
    %c0_12 = arith.constant 0 : index
    %c3 = arith.constant 3 : index
    %9 = vector.load %arg2[%c0_12, %c3] : memref<88x8xf32, #tpu.memory_space<vmem>>, vector<88x1xf32>
    %c0_13 = arith.constant 0 : index
    %c4 = arith.constant 4 : index
    %10 = vector.load %arg2[%c0_13, %c4] : memref<88x8xf32, #tpu.memory_space<vmem>>, vector<88x1xf32>
    %c0_14 = arith.constant 0 : index
    %c5 = arith.constant 5 : index
    %11 = vector.load %arg2[%c0_14, %c5] : memref<88x8xf32, #tpu.memory_space<vmem>>, vector<88x1xf32>
    %12 = vector.broadcast %8 : vector<88x1xf32> to vector<88x2xf32>
    %13 = arith.mulf %3, %12 : vector<88x2xf32>
    %14 = vector.broadcast %9 : vector<88x1xf32> to vector<88x2xf32>
    %15 = arith.mulf %5, %14 : vector<88x2xf32>
    %16 = arith.addf %13, %15 : vector<88x2xf32>
    %17 = vector.broadcast %7 : vector<88x1xf32> to vector<88x2xf32>
    %18 = arith.mulf %1, %17 : vector<88x2xf32>
    %19 = vector.broadcast %11 : vector<88x1xf32> to vector<88x2xf32>
    %20 = arith.mulf %16, %19 : vector<88x2xf32>
    %21 = arith.addf %18, %20 : vector<88x2xf32>
    %cst = arith.constant dense<0.000000e+00> : vector<2xf32>
    %22 = vector.multi_reduction <add>, %21, %cst [0] : vector<88x2xf32> to vector<2xf32>
    %23 = vector.shape_cast %22 : vector<2xf32> to vector<1x2xf32>
    %c0_15 = arith.constant 0 : index
    %c0_16 = arith.constant 0 : index
    %24 = vector.load %arg3[%c0_15, %c0_16] : memref<2x2xf32, #tpu.memory_space<vmem>>, vector<1x2xf32>
    tpu.vector_store %arg3[%c0_15, %c0_16], %23 {strides = array<i32>} : memref<2x2xf32, #tpu.memory_space<vmem>>, vector<1x2xf32>,
    %25 = vector.broadcast %6 : vector<88x1xf32> to vector<88x2xf32>
    %26 = arith.mulf %1, %25 : vector<88x2xf32>
    %27 = vector.broadcast %10 : vector<88x1xf32> to vector<88x2xf32>
    %28 = arith.mulf %16, %27 : vector<88x2xf32>
    %29 = arith.addf %26, %28 : vector<88x2xf32>
    %cst_17 = arith.constant dense<0.000000e+00> : vector<2xf32>
    %30 = vector.multi_reduction <add>, %29, %cst_17 [0] : vector<88x2xf32> to vector<2xf32>
    %31 = vector.shape_cast %30 : vector<2xf32> to vector<1x2xf32>
    %c1_18 = arith.constant 1 : index
    %c0_19 = arith.constant 0 : index
    %32 = vector.load %arg3[%c1_18, %c0_19] : memref<2x2xf32, #tpu.memory_space<vmem>>, vector<1x2xf32>
    tpu.vector_store %arg3[%c1_18, %c0_19], %31 {strides = array<i32>} : memref<2x2xf32, #tpu.memory_space<vmem>>, vector<1x2xf32>,
    return
  }
  func.func @transform_0(%arg0: i32) -> (i32, i32, i32) {
    %c0_i32 = arith.constant 0 : i32
    %c0_i32_0 = arith.constant 0 : i32
    %c0_i32_1 = arith.constant 0 : i32
    return %c0_i32, %c0_i32_0, %arg0 : i32, i32, i32
  }
  func.func @transform_1(%arg0: i32) -> (i32, i32) {
    %c0_i32 = arith.constant 0 : i32
    %c0_i32_0 = arith.constant 0 : i32
    %c0_i32_1 = arith.constant 0 : i32
    return %c0_i32, %c0_i32_0 : i32, i32
  }
  func.func @transform_2(%arg0: i32) -> (i32, i32) {
    %c0_i32 = arith.constant 0 : i32
    %c0_i32_0 = arith.constant 0 : i32
    return %c0_i32, %arg0 : i32, i32
  }
}

</mosaic_0001>

<bundles_post_ra>
// kernel: _forward.2
= control target key start
LH: loop header
LB: loop body
LE: loop exit
PB: predicated region body
PF: predicated region fallthrough
CT: control target
= control target key end

     0   :  { %v1084_v3 = vmov 2   ;;  %v1085_v13 = vmov 3   ;;  %v1086_v14 = vmov 1   ;;  %v1087_v15 = vmov 5   ;;  %s1600_s0 = inlined_call_operand.vmem [shape: f32[88,8], index: 0, kind: input, shape index: {}]   ;;  %s1601_s1 = inlined_call_operand.vmem [shape: f32[3,84,2], index: 1, kind: input, shape index: {}]   ;;  %s1602_s2 = inlined_call_operand.<no memory space> [shape: f32[], index: 2, kind: input, shape index: {}]   ;;  %s1603_s3 = inlined_call_operand.vmem [shape: f32[2,2], index: 3, kind: output, shape index: {}]  }
   0x1   :  { %v1113_v0 = vstv %s1602_s2  ;;  %v1118_v1 = vld [vmem:[%s1600_s0 + $0x10] sm:$0xff]  ;;  %v1123_v2 = vld [vmem:[%s1600_s0] sm:$0xff]  ;;  %1060 = vset.pattern.permute.xlu1 %v1084_v3  ;;  %1059 = vset.pattern.permute.xlu0 %v1084_v3  ;;  %v1130_v4 = vld [vmem:[%s1600_s0 + $0x18] sm:$0xff]  ;;  %v1088_v16 = vmov 0   ;;  %v1089_v17 = vmov 4   ;;  %v19_v22 = vlaneseq }
   0x2   :  { %597 = vperm.xlu1 %1060, %v1118_v1   ;;  %587 = vperm.xlu0 %1059, %v1123_v2   ;;  %v1135_v5 = vld [vmem:[%s1600_s0 + $0x8] sm:$0xff]  ;;  %v1147_v7 = vld [vmem:[%s1600_s0 + $0x20] sm:$0xff]  ;;  %v1154_v8 = vld [vmem:[%s1600_s0 + $0x38] sm:$0xff]  ;;  %vm838_vm1 = vcmask 15360   ;;  %vm866_vm3 = vcmask 8192  }
   0x3   :  { %v1142_v6 = vld [vmem:[%s1600_s0 + $0x28] sm:$0xff]  ;;  %v1159_v9 = vld [vmem:[%s1600_s0 + $0x30] sm:$0xff]  ;;  %v1171_v11 = vld [vmem:[%s1600_s0 + $0x40] sm:$0xff]  ;;  %v1242_v25 = vand.u32 127, %v19_v22 }
   0x4   :  { %v1166_v10 = vld [vmem:[%s1600_s0 + $0x48] sm:$0xff]  ;;  %v1178_v12 = vld [vmem:[%s1600_s0 + $0x50] sm:$0xff]  ;;  %v1031_v28 = vld [vmem:[%s1601_s1 + $0x58] sm:$0xff] }
   0x5   :  { %vm22_vm0 = vcmp.lt.s32.totalorder %v1242_v25, 2  ;;  %v1042_v31 = vld [vmem:[%s1601_s1 + $0xb0] sm:$0xff]  ;;  %v1033_v34 = vld [vmem:[%s1601_s1 + $0x68] sm:$0xff]  ;;  %v1044_v37 = vld [vmem:[%s1601_s1 + $0xc0] sm:$0xff] }
   0x6   :  { %602 = vperm.xlu1 %1060, %v1130_v4   ;;  %592 = vperm.xlu0 %1059, %v1135_v5   ;;  %v198_v32 = vsel %vm22_vm0, %v1031_v28, %v1113_v0  ;;  %v374_v33 = vsel %vm22_vm0, %v1042_v31, %v1113_v0  ;;  %v230_v40 = vsel %vm22_vm0, %v1033_v34, %v1113_v0  ;;  %v1034_v42 = vld [vmem:[%s1601_s1 + $0x70] sm:$0xff]  ;;  %v1045_v43 = vld [vmem:[%s1601_s1 + $0xc8] sm:$0xff]  ;;  %v1036_v51 = vld [vmem:[%s1601_s1 + $0x80] sm:$0xff] }
   0x7   :  { %v406_v41 = vsel %vm22_vm0, %v1044_v37, %v1113_v0  ;;  %v246_v49 = vsel %vm22_vm0, %v1034_v42, %v1113_v0  ;;  %v422_v50 = vsel %vm22_vm0, %v1045_v43, %v1113_v0  ;;  %v1047_v52 = vld [vmem:[%s1601_s1 + $0xd8] sm:$0xff]  ;;  %v278_v58 = vsel %vm22_vm0, %v1036_v51, %v1113_v0  ;;  %v1038_v60 = vld [vmem:[%s1601_s1 + $0x90] sm:$0xff]  ;;  %v1049_v61 = vld [vmem:[%s1601_s1 + $0xe8] sm:$0xff] }
   0x8   :  { %v454_v59 = vsel %vm22_vm0, %v1047_v52, %v1113_v0  ;;  %v1021_v42 = vld [vmem:[%s1601_s1 + $0x8] sm:$0xff] }
   0xa   :  { %612 = vperm.xlu1 %1060, %v1142_v6   ;;  %607 = vperm.xlu0 %1059, %v1147_v7  }
   0xe   :  { %622 = vperm.xlu1 %1060, %v1154_v8   ;;  %617 = vperm.xlu0 %1059, %v1159_v9  }
  0x12   :  { %632 = vperm.xlu1 %1060, %v1166_v10   ;;  %627 = vperm.xlu0 %1059, %v1171_v11  }
  0x16   :  { %1061 = vset.pattern.permute.xlu1 %v1085_v13  ;;  %637 = vperm.xlu0 %1059, %v1178_v12  }
  0x17   :  { %652 = vperm.xlu1 %1061, %v1123_v2  }
  0x1a   :  { %1062 = vset.pattern.permute.xlu0 %v1085_v13 }
  0x1b   :  { %660 = vperm.xlu1 %1061, %v1118_v1   ;;  %656 = vperm.xlu0 %1062, %v1135_v5  }
  0x1f   :  { %664 = vperm.xlu1 %1061, %v1130_v4   ;;  %668 = vperm.xlu0 %1062, %v1147_v7  }
  0x23   :  { %672 = vperm.xlu1 %1061, %v1142_v6   ;;  %676 = vperm.xlu0 %1062, %v1159_v9  }
  0x27   :  { %680 = vperm.xlu1 %1061, %v1154_v8   ;;  %684 = vperm.xlu0 %1062, %v1171_v11  }
  0x2b   :  { %688 = vperm.xlu1 %1061, %v1166_v10   ;;  %692 = vperm.xlu0 %1062, %v1178_v12  }
  0x2f   :  { %1063 = vset.pattern.permute.xlu1 %v1086_v14  ;;  %1064 = vset.pattern.permute.xlu0 %v1086_v14 }
  0x30   :  { %718 = vperm.xlu1 %1063, %v1123_v2   ;;  %722 = vperm.xlu0 %1064, %v1135_v5  }
  0x34   :  { %726 = vperm.xlu1 %1063, %v1118_v1   ;;  %734 = vperm.xlu0 %1064, %v1147_v7  }
  0x38   :  { %730 = vperm.xlu1 %1063, %v1130_v4   ;;  %742 = vperm.xlu0 %1064, %v1159_v9  }
  0x3c   :  { %738 = vperm.xlu1 %1063, %v1142_v6   ;;  %750 = vperm.xlu0 %1064, %v1171_v11  }
  0x40   :  { %746 = vperm.xlu1 %1063, %v1154_v8   ;;  %758 = vperm.xlu0 %1064, %v1178_v12  }
  0x44   :  { %754 = vperm.xlu1 %1063, %v1166_v10   ;;  %1066 = vset.pattern.permute.xlu0 %v1087_v15 }
  0x45   :  { %777 = vperm.xlu0 %1066, %v1135_v5  }
  0x48   :  { %1065 = vset.pattern.permute.xlu1 %v1087_v15 }
  0x49   :  { %773 = vperm.xlu1 %1065, %v1123_v2   ;;  %789 = vperm.xlu0 %1066, %v1147_v7  }
  0x4d   :  { %781 = vperm.xlu1 %1065, %v1118_v1   ;;  %797 = vperm.xlu0 %1066, %v1159_v9  }
  0x51   :  { %785 = vperm.xlu1 %1065, %v1130_v4   ;;  %1067 = vset.pattern.permute.xlu0 %v1088_v16 }
  0x52   :  { %869 = vperm.xlu0 %1067, %v1123_v2  }
  0x55   :  { %793 = vperm.xlu1 %1065, %v1142_v6  }
  0x56   :  { %881 = vperm.xlu0 %1067, %v1130_v4  }
  0x59   :  { %801 = vperm.xlu1 %1065, %v1154_v8  }
  0x5a   :  { %1072 = vset.pattern.permute.xlu0 %v1089_v17 }
  0x5b   :  { %928 = vperm.xlu0 %1072, %v1135_v5  }
  0x5d   :  { %1068 = vset.pattern.permute.xlu1 %v1088_v16 }
  0x5e   :  { %873 = vperm.xlu1 %1068, %v1135_v5   ;;  %v486_v5 = vsel %vm22_vm0, %v1049_v61, %v1113_v0  ;;  %v1022_v61 = vld [vmem:[%s1601_s1 + $0x10] sm:$0xff] }
  0x5f   :  { %940 = vperm.xlu0 %1072, %v1147_v7  }
  0x62   :  { %1069 = vset.pattern.permute.xlu1 %v1089_v17 }
  0x63   :  { %924 = vperm.xlu1 %1069, %v1123_v2   ;;  %952 = vperm.xlu0 %1072, %v1154_v8  }
  0x67   :  { %1070 = vset.pattern.permute.xlu1 %v1088_v16  ;;  %956 = vperm.xlu0 %1072, %v1171_v11  }
  0x68   :  { %877 = vperm.xlu1 %1070, %v1118_v1  }
  0x6b   :  { %1078 = vset.pattern.permute.xlu0 %v1088_v16 }
  0x6c   :  { %1071 = vset.pattern.permute.xlu1 %v1089_v17  ;;  %893 = vperm.xlu0 %1078, %v1159_v9  }
  0x6d   :  { %932 = vperm.xlu1 %1071, %v1118_v1  }
  0x70   :  { %905 = vperm.xlu0 %1078, %v1166_v10  }
  0x71   :  { %936 = vperm.xlu1 %1071, %v1130_v4   ;;  %v310_v4 = vsel %vm22_vm0, %v1038_v60, %v1113_v0 }
  0x74   :  { %909 = vperm.xlu0 %1078, %v1178_v12  }
  0x75   :  { %1073 = vset.pattern.permute.xlu1 %v1088_v16 }
  0x76   :  { %885 = vperm.xlu1 %1073, %v1147_v7   ;;  %v1051_v7 = vld [vmem:[%s1601_s1 + $0xf8] sm:$0xff] }
  0x78   :  { %1083 = vset.pattern.permute.xlu0 %v1089_v17 }
  0x7a   :  { %889 = vperm.xlu1 %1073, %v1142_v6  }
  0x7d   :  { %v598_v18 = vpop.permute.xlu1 %597  ;;  %v588_v19 = vpop.permute.xlu0 %587 }
  0x7e   :  { %1074 = vset.pattern.permute.xlu1 %v1089_v17  ;;  %v640_v35 = vmul.f32 %v588_v19, %v198_v32  ;;  %v642_v47 = vmul.f32 %v598_v18, %v230_v40 }
  0x7f   :  { %944 = vperm.xlu1 %1074, %v1142_v6   ;;  %v1040_v6 = vld [vmem:[%s1601_s1 + $0xa0] sm:$0xff] }
  0x80   :  { %v342_v14 = vsel %vm22_vm0, %v1040_v6, %v1113_v0 }
  0x81   :  { %v603_v20 = vpop.permute.xlu1 %602  ;;  %v1235_v21 = vpop.permute.xlu0 %592 }
  0x82   :  { %v643_v56 = vmul.f32 %v603_v20, %v246_v49 }
  0x83   :  { %948 = vperm.xlu1 %1074, %v1159_v9  }
  0x85   :  { %v613_v23 = vpop.permute.xlu1 %612  ;;  %v1238_v24 = vpop.permute.xlu0 %607 }
  0x86   :  { %v645_v2 = vmul.f32 %v613_v23, %v278_v58 }
  0x87   :  { %1075 = vset.pattern.permute.xlu1 %v1088_v16 }
  0x88   :  { %897 = vperm.xlu1 %1075, %v1154_v8  }
  0x89   :  { %v623_v26 = vpop.permute.xlu1 %622  ;;  %v1244_v27 = vpop.permute.xlu0 %617 }
  0x8c   :  { %1076 = vset.pattern.permute.xlu1 %v1087_v15 }
  0x8d   :  { %v1251_v29 = vpop.permute.xlu1 %632  ;;  %805 = vperm.xlu1 %1076, %v1171_v11   ;;  %v1254_v30 = vpop.permute.xlu0 %627 }
  0x8e   :  { %v649_v20 = vmul.f32 %v1251_v29, %v342_v14 }
  0x91   :  { %1077 = vset.pattern.permute.xlu1 %v1088_v16  ;;  %v1268_v36 = vpop.permute.xlu0 %637 }
  0x92   :  { %901 = vperm.xlu1 %1077, %v1171_v11   ;;  %v653_v38 = vpop.permute.xlu1 %652  ;;  %v647_v11 = vmul.f32 %v623_v26, %v310_v4 }
  0x93   :  { %v695_v39 = vmul.f32 %v653_v38, %v374_v33 }
  0x95   :  { %v1286_v44 = vadd.f32 %v695_v39, %v640_v35 }
  0x96   :  { %1079 = vset.pattern.permute.xlu1 %v1087_v15  ;;  %v661_v45 = vpop.permute.xlu1 %660  ;;  %v657_v46 = vpop.permute.xlu0 %656 }
  0x97   :  { %v697_v48 = vmul.f32 %v661_v45, %v406_v41  ;;  %809 = vperm.xlu1 %1079, %v1166_v10  }
  0x99   :  { %v1302_v53 = vadd.f32 %v697_v48, %v642_v47  ;;  %v1035_v47 = vld [vmem:[%s1601_s1 + $0x78] sm:$0xff]  ;;  %v1046_v48 = vld [vmem:[%s1601_s1 + $0xd0] sm:$0xff] }
  0x9a   :  { %v665_v54 = vpop.permute.xlu1 %664  ;;  %v1304_v55 = vpop.permute.xlu0 %668  ;;  %v262_v52 = vsel %vm22_vm0, %v1035_v47, %v1113_v0 }
  0x9b   :  { %v698_v57 = vmul.f32 %v665_v54, %v422_v50  ;;  %1080 = vset.pattern.permute.xlu1 %v1089_v17  ;;  %v1037_v54 = vld [vmem:[%s1601_s1 + $0x88] sm:$0xff] }
  0x9c   :  { %960 = vperm.xlu1 %1080, %v1166_v10  }
  0x9d   :  { %v1320_v62 = vadd.f32 %v698_v57, %v643_v56  ;;  %v438_v56 = vsel %vm22_vm0, %v1046_v48, %v1113_v0 }
  0x9e   :  { %v673_v63 = vpop.permute.xlu1 %672  ;;  %v1322_v1 = vpop.permute.xlu0 %676 }
  0x9f   :  { %v700_v3 = vmul.f32 %v673_v63, %v454_v59  ;;  %v1048_v59 = vld [vmem:[%s1601_s1 + $0xe0] sm:$0xff]  ;;  %v644_v63 = vmul.f32 %v1238_v24, %v262_v52 }
  0xa0   :  { %1081 = vset.pattern.permute.xlu1 %v1087_v15  ;;  %v518_v15 = vsel %vm22_vm0, %v1051_v7, %v1113_v0  ;;  %v470_v6 = vsel %vm22_vm0, %v1048_v59, %v1113_v0 }
  0xa1   :  { %813 = vperm.xlu1 %1081, %v1178_v12   ;;  %v1338_v8 = vadd.f32 %v700_v3, %v645_v2  ;;  %v294_v2 = vsel %vm22_vm0, %v1037_v54, %v1113_v0  ;;  %v699_v3 = vmul.f32 %v1304_v55, %v438_v56  ;;  %v1023_v55 = vld [vmem:[%s1601_s1 + $0x18] sm:$0xff] }
  0xa2   :  { %v681_v9 = vpop.permute.xlu1 %680  ;;  %v1340_v10 = vpop.permute.xlu0 %684 }
  0xa3   :  { %v702_v13 = vmul.f32 %v681_v9, %v486_v5  ;;  %v1024_v9 = vld [vmem:[%s1601_s1 + $0x20] sm:$0xff] }
  0xa5   :  { %1082 = vset.pattern.permute.xlu1 %v1089_v17  ;;  %v1349_v16 = vadd.f32 %v702_v13, %v647_v11  ;;  %v1032_v17 = vld [vmem:[%s1601_s1 + $0x60] sm:$0xff]  ;;  %v1439_v13 = vsel %vm22_vm0, %v1022_v61, %v1113_v0 }
  0xa6   :  { %964 = vperm.xlu1 %1082, %v1178_v12   ;;  %v689_v18 = vpop.permute.xlu1 %688  ;;  %v1352_v19 = vpop.permute.xlu0 %692  ;;  %v1043_v12 = vld [vmem:[%s1601_s1 + $0xb8] sm:$0xff]  ;;  %v214_v38 = vsel %vm22_vm0, %v1032_v17, %v1113_v0  ;;  %v1026_v17 = vld [vmem:[%s1601_s1 + $0x30] sm:$0xff] }
  0xa7   :  { %v704_v23 = vmul.f32 %v689_v18, %v518_v15  ;;  %v390_v39 = vsel %vm22_vm0, %v1043_v12, %v1113_v0  ;;  %v641_v40 = vmul.f32 %v1235_v21, %v214_v38  ;;  %v1392_v21 = vsel %vm22_vm0, %v1021_v42, %v1113_v0 }
  0xa8   :  { %v696_v41 = vmul.f32 %v657_v46, %v390_v39  ;;  %v13_v46 = vld [vmem:[%s1601_s1] sm:$0xff]  ;;  %v646_v15 = vmul.f32 %v1244_v27, %v294_v2  ;;  %v701_v18 = vmul.f32 %v1322_v1, %v470_v6  ;;  %v70_v38 = vsel %vm22_vm0, %v1023_v55, %v1113_v0 }
  0xa9   :  { %v1355_v26 = vadd.f32 %v704_v23, %v649_v20  ;;  %v1418_v60 = vsel %vm22_vm0, %v13_v46, %v1113_v0  ;;  %v1449_v20 = vsel %vm22_vm0, %v1024_v9, %v1113_v0  ;;  %v1451_v23 = vadd.f32 %v699_v3, %v644_v63 }
  0xaa   :  { %v1399_v50 = vadd.f32 %v696_v41, %v641_v40  ;;  %v1471_v48 = vsel %vm22_vm0, %v1026_v17, %v1113_v0  ;;  %v1474_v54 = vadd.f32 %v701_v18, %v646_v15 }
  0xab   :  { %v719_v28 = vpop.permute.xlu1 %718  ;;  %v723_v31 = vpop.permute.xlu0 %722 }
  0xac   :  { %v762_v57 = vmul.f32 %v723_v31, %v1392_v21  ;;  %v761_v7 = vmul.f32 %v719_v28, %v1418_v60 }
  0xaf   :  { %v727_v32 = vpop.permute.xlu1 %726  ;;  %v735_v33 = vpop.permute.xlu0 %734 }
  0xb0   :  { %v763_v31 = vmul.f32 %v727_v32, %v1439_v13  ;;  %v765_v41 = vmul.f32 %v735_v33, %v1449_v20  ;;  %v1025_v32 = vld [vmem:[%s1601_s1 + $0x28] sm:$0xff] }
  0xb1   :  { %v1480_v56 = vsel %vm22_vm0, %v1025_v32, %v1113_v0 }
  0xb3   :  { %v731_v34 = vpop.permute.xlu1 %730  ;;  %v1357_v35 = vpop.permute.xlu0 %742 }
  0xb4   :  { %v767_v59 = vmul.f32 %v1357_v35, %v1471_v48 }
  0xb7   :  { %v1365_v37 = vpop.permute.xlu1 %738  ;;  %v1367_v29 = vpop.permute.xlu0 %750 }
  0xbb   :  { %v1379_v43 = vpop.permute.xlu1 %746  ;;  %v1381_v45 = vpop.permute.xlu0 %758 }
  0xbf   :  { %v1397_v49 = vpop.permute.xlu1 %754 }
  0xc0   :  { %v778_v51 = vpop.permute.xlu0 %777 }
  0xc1   :  { %v817_v58 = vmul.f32 %v778_v51, %v1399_v50  ;;  %v764_v51 = vmul.f32 %v731_v34, %v70_v38  ;;  %v1027_v34 = vld [vmem:[%s1601_s1 + $0x38] sm:$0xff] }
  0xc2   :  { %v1495_v35 = vsel %vm22_vm0, %v1027_v34, %v1113_v0 }
  0xc3   :  { %v828_v11 = vadd.f32 %v817_v58, %v762_v57 }
  0xc4   :  { %v774_v4 = vpop.permute.xlu1 %773  ;;  %v790_v5 = vpop.permute.xlu0 %789 }
  0xc5   :  { %v816_v24 = vmul.f32 %v774_v4, %v1286_v44  ;;  %v840_v12 = vsel %vm838_vm1, %v828_v11, 0.0  ;;  %v820_v42 = vmul.f32 %v790_v5, %v1451_v23  ;;  %v766_v4 = vmul.f32 %v1365_v37, %v1480_v56 }
  0xc6   :  { %v768_v37 = vmul.f32 %v1379_v43, %v1495_v35 }
  0xc7   :  { %v827_v14 = vadd.f32 %v816_v24, %v761_v7  ;;  %v831_v61 = vadd.f32 %v820_v42, %v765_v41 }
  0xc8   :  { %v782_v28 = vpop.permute.xlu1 %781  ;;  %v798_v40 = vpop.permute.xlu0 %797 }
  0xc9   :  { %v839_v27 = vsel %vm838_vm1, %v827_v14, 0.0  ;;  %v818_v1 = vmul.f32 %v782_v28, %v1302_v53  ;;  %v822_v63 = vmul.f32 %v798_v40, %v1474_v54  ;;  %v846_v9 = vsel %vm838_vm1, %v831_v61, 0.0 }
  0xca   :  { %v841_v39 = vadd.f32 %v840_v12, %v839_v27 }
  0xcb   :  { %v829_v47 = vadd.f32 %v818_v1, %v763_v31  ;;  %v833_v11 = vadd.f32 %v822_v63, %v767_v59 }
  0xcc   :  { %v786_v46 = vpop.permute.xlu1 %785 }
  0xcd   :  { %v842_v52 = vsel %vm838_vm1, %v829_v47, 0.0  ;;  %v819_v33 = vmul.f32 %v786_v46, %v1320_v62  ;;  %v870_v58 = vpop.permute.xlu0 %869  ;;  %v850_v17 = vsel %vm838_vm1, %v833_v11, 0.0 }
  0xce   :  { %v843_v57 = vadd.f32 %v842_v52, %v841_v39  ;;  %v912_v42 = vmul.f32 %v870_v58, %v1418_v60 }
  0xcf   :  { %v830_v2 = vadd.f32 %v819_v33, %v764_v51 }
  0xd0   :  { %v794_v3 = vpop.permute.xlu1 %793 }
  0xd1   :  { %v844_v5 = vsel %vm838_vm1, %v830_v2, 0.0  ;;  %v821_v6 = vmul.f32 %v794_v3, %v1338_v8  ;;  %v882_v14 = vpop.permute.xlu0 %881 }
  0xd2   :  { %v845_v7 = vadd.f32 %v844_v5, %v843_v57  ;;  %v915_v60 = vmul.f32 %v882_v14, %v70_v38 }
  0xd3   :  { %v832_v24 = vadd.f32 %v821_v6, %v766_v4 }
  0xd4   :  { %v847_v55 = vadd.f32 %v846_v9, %v845_v7  ;;  %v802_v15 = vpop.permute.xlu1 %801 }
  0xd5   :  { %v848_v18 = vsel %vm838_vm1, %v832_v24, 0.0  ;;  %v823_v28 = vmul.f32 %v802_v15, %v1349_v16 }
  0xd6   :  { %v849_v31 = vadd.f32 %v848_v18, %v847_v55  ;;  %v929_v41 = vpop.permute.xlu0 %928 }
  0xd7   :  { %v834_v12 = vadd.f32 %v823_v28, %v768_v37  ;;  %v968_v43 = vmul.f32 %v929_v41, %v1399_v50 }
  0xd8   :  { %v851_v27 = vadd.f32 %v850_v17, %v849_v31  ;;  %v1039_v31 = vld [vmem:[%s1601_s1 + $0x98] sm:$0xff] }
  0xd9   :  { %v852_v1 = vsel %vm838_vm1, %v834_v12, 0.0  ;;  %v874_v39 = vpop.permute.xlu1 %873 }
  0xda   :  { %v1504_v40 = vadd.f32 %v852_v1, %v851_v27  ;;  %v913_v32 = vmul.f32 %v874_v39, %v1392_v21  ;;  %v941_v2 = vpop.permute.xlu0 %940 }
  0xdb   :  { %v971_v11 = vmul.f32 %v941_v2, %v1451_v23 }
  0xdc   :  { %v979_v46 = vadd.f32 %v968_v43, %v913_v32 }
  0xde   :  { %v925_v47 = vpop.permute.xlu1 %924  ;;  %v990_v33 = vsel %vm838_vm1, %v979_v46, 0.0  ;;  %v953_v6 = vpop.permute.xlu0 %952 }
  0xdf   :  { %v967_v51 = vmul.f32 %v925_v47, %v1286_v44  ;;  %v974_v47 = vmul.f32 %v953_v6, %v1349_v16 }
  0xe1   :  { %v978_v52 = vadd.f32 %v967_v51, %v912_v42 }
  0xe2   :  { %v957_v38 = vpop.permute.xlu0 %956 }
  0xe3   :  { %v989_v57 = vsel %vm838_vm1, %v978_v52, 0.0  ;;  %v878_v59 = vpop.permute.xlu1 %877  ;;  %v174_v52 = vshrl.u32 %v19_v22, 7 }
  0xe4   :  { %v991_v34 = vadd.f32 %v990_v33, %v989_v57  ;;  %v914_v63 = vmul.f32 %v878_v59, %v1439_v13 }
  0xe7   :  { %v894_v18 = vpop.permute.xlu0 %893 }
  0xe8   :  { %v933_v61 = vpop.permute.xlu1 %932  ;;  %v918_v17 = vmul.f32 %v894_v18, %v1471_v48  ;;  %v1028_v48 = vld [vmem:[%s1601_s1 + $0x40] sm:$0xff] }
  0xe9   :  { %v969_v21 = vmul.f32 %v933_v61, %v1302_v53 }
  0xeb   :  { %v980_v58 = vadd.f32 %v969_v21, %v914_v63  ;;  %v175_v21 = vadd.s32 80, %v174_v52 }
  0xec   :  { %v937_v50 = vpop.permute.xlu1 %936 }
  0xed   :  { %v992_v3 = vsel %vm838_vm1, %v980_v58, 0.0  ;;  %v970_v44 = vmul.f32 %v937_v50, %v1320_v62  ;;  %vm176_vm2 = vcmp.lt.s32.totalorder %v175_v21, 84 }
  0xee   :  { %v993_v4 = vadd.f32 %v992_v3, %v991_v34 }
  0xef   :  { %v981_v5 = vadd.f32 %v970_v44, %v915_v60  ;;  %v1041_v60 = vld [vmem:[%s1601_s1 + $0xa8] sm:$0xff] }
  0xf1   :  { %v994_v7 = vsel %vm838_vm1, %v981_v5, 0.0  ;;  %v886_v9 = vpop.permute.xlu1 %885  ;;  %v353_v5 = vsel %vm176_vm2, %v1041_v60, %v1113_v0 }
  0xf2   :  { %v995_v24 = vadd.f32 %v994_v7, %v993_v4  ;;  %v916_v13 = vmul.f32 %v886_v9, %v1449_v20  ;;  %v1050_v20 = vld [vmem:[%s1601_s1 + $0xf0] sm:$0xff] }
  0xf4   :  { %v982_v53 = vadd.f32 %v971_v11, %v916_v13  ;;  %v358_v13 = vsel %vm22_vm0, %v353_v5, %v1113_v0 }
  0xf5   :  { %v890_v55 = vpop.permute.xlu1 %889 }
  0xf6   :  { %v996_v14 = vsel %vm838_vm1, %v982_v53, 0.0  ;;  %v917_v62 = vmul.f32 %v890_v55, %v1480_v56  ;;  %v502_v56 = vsel %vm22_vm0, %v1050_v20, %v1113_v0  ;;  %v1030_v55 = vld [vmem:[%s1601_s1 + $0x50] sm:$0xff] }
  0xf7   :  { %v997_v15 = vadd.f32 %v996_v14, %v995_v24  ;;  %v703_v42 = vmul.f32 %v1340_v10, %v502_v56  ;;  %v906_v14 = vpop.permute.xlu0 %905  ;;  %v177_v18 = vsel %vm176_vm2, %v1030_v55, %v1113_v0 }
  0xfa   :  { %v945_v37 = vpop.permute.xlu1 %944 }
  0xfb   :  { %v972_v28 = vmul.f32 %v945_v37, %v1338_v8  ;;  %v326_v8 = vsel %vm22_vm0, %v1039_v31, %v1113_v0  ;;  %v910_v56 = vpop.permute.xlu0 %909 }
  0xfc   :  { %v648_v32 = vmul.f32 %v1254_v30, %v326_v8  ;;  %v150_v30 = vsel %vm22_vm0, %v1028_v48, %v1113_v0 }
  0xfd   :  { %v983_v23 = vadd.f32 %v972_v28, %v917_v62  ;;  %v769_v34 = vmul.f32 %v1367_v29, %v150_v30  ;;  %v1052_v29 = vld [vmem:[%s1601_s1 + $0x100] sm:$0xff] }
  0xfe   :  { %v949_v12 = vpop.permute.xlu1 %948  ;;  %v714_v10 = vadd.f32 %v703_v42, %v648_v32  ;;  %v529_v6 = vsel %vm176_vm2, %v1052_v29, %v1113_v0 }
  0xff   :  { %v998_v27 = vsel %vm838_vm1, %v983_v23, 0.0  ;;  %v973_v1 = vmul.f32 %v949_v12, %v1474_v54  ;;  %v534_v53 = vsel %vm22_vm0, %v529_v6, %v1113_v0  ;;  %v182_v23 = vsel %vm22_vm0, %v177_v18, %v1113_v0 }
 0x100   :  { %v999_v39 = vadd.f32 %v998_v27, %v997_v15  ;;  %v975_v58 = vmul.f32 %v957_v38, %v714_v10  ;;  %v705_v37 = vmul.f32 %v1352_v19, %v534_v53  ;;  %v771_v19 = vmul.f32 %v1381_v45, %v182_v23 }
 0x101   :  { %v984_v41 = vadd.f32 %v973_v1, %v918_v17  ;;  %v922_v42 = vmul.f32 %v910_v56, %v182_v23 }
 0x103   :  { %v1000_v54 = vsel %vm838_vm1, %v984_v41, 0.0  ;;  %v898_v43 = vpop.permute.xlu1 %897 }
 0x104   :  { %v1001_v46 = vadd.f32 %v1000_v54, %v999_v39  ;;  %v919_v51 = vmul.f32 %v898_v43, %v1495_v35  ;;  %v1029_v35 = vld [vmem:[%s1601_s1 + $0x48] sm:$0xff] }
 0x105   :  { %v166_v44 = vsel %vm22_vm0, %v1029_v35, %v1113_v0 }
 0x106   :  { %v985_v33 = vadd.f32 %v974_v47, %v919_v51  ;;  %v770_v11 = vmul.f32 %v1397_v49, %v166_v44  ;;  %v921_v15 = vmul.f32 %v906_v14, %v166_v44  ;;  %v650_v49 = vmul.f32 %v1268_v36, %v358_v13 }
 0x108   :  { %v1002_v57 = vsel %vm838_vm1, %v985_v33, 0.0  ;;  %v806_v59 = vpop.permute.xlu1 %805  ;;  %v716_v12 = vadd.f32 %v705_v37, %v650_v49 }
 0x109   :  { %v1003_v61 = vadd.f32 %v1002_v57, %v1001_v46  ;;  %v824_v63 = vmul.f32 %v806_v59, %v714_v10 }
 0x10b   :  { %v835_v16 = vadd.f32 %v824_v63, %v769_v34 }
 0x10d   :  { %v854_v22 = vsel %vm838_vm1, %v835_v16, 0.0  ;;  %v902_v2 = vpop.permute.xlu1 %901 }
 0x10e   :  { %v855_v50 = vadd.f32 %v854_v22, %v1504_v40  ;;  %v920_v3 = vmul.f32 %v902_v2, %v150_v30 }
 0x110   :  { %v986_v4 = vadd.f32 %v975_v58, %v920_v3 }
 0x112   :  { %v1004_v7 = vsel %vm838_vm1, %v986_v4, 0.0  ;;  %v810_v9 = vpop.permute.xlu1 %809 }
 0x113   :  { %v1005_v24 = vadd.f32 %v1004_v7, %v1003_v61  ;;  %v825_v40 = vmul.f32 %v810_v9, %v1355_v26 }
 0x115   :  { %v836_v38 = vadd.f32 %v825_v40, %v770_v11 }
 0x117   :  { %v856_v62 = vsel %vm838_vm1, %v836_v38, 0.0  ;;  %v961_v28 = vpop.permute.xlu1 %960 }
 0x118   :  { %v857_v31 = vadd.f32 %v856_v62, %v855_v50  ;;  %v976_v20 = vmul.f32 %v961_v28, %v1355_v26 }
 0x11a   :  { %v987_v17 = vadd.f32 %v976_v20, %v921_v15 }
 0x11c   :  { %v1006_v27 = vsel %vm838_vm1, %v987_v17, 0.0  ;;  %v814_v36 = vpop.permute.xlu1 %813 }
 0x11d   :  { %v1007_v1 = vadd.f32 %v1006_v27, %v1005_v24  ;;  %v826_v8 = vmul.f32 %v814_v36, %v716_v12 }
 0x11f   :  { %v837_v39 = vadd.f32 %v826_v8, %v771_v19 }
 0x121   :  { %v858_v41 = vsel %vm838_vm1, %v837_v39, 0.0  ;;  %v965_v32 = vpop.permute.xlu1 %964 }
 0x122   :  { %v859_v26 = vadd.f32 %v858_v41, %v857_v31  ;;  %v977_v48 = vmul.f32 %v965_v32, %v716_v12 }
 0x124   :  { %v860_v54 = vrot.slane %v859_v26, 4  ;;  %v988_v25 = vadd.f32 %v977_v48, %v922_v42 }
 0x126   :  { %v861_v0 = vadd.f32 %v860_v54, %v859_v26  ;;  %v1008_v43 = vsel %vm838_vm1, %v988_v25, 0.0 }
 0x127   :  { %v1009_v47 = vadd.f32 %v1008_v43, %v1007_v1 }
 0x128   :  { %v862_v46 = vrot.slane %v861_v0, 2 }
 0x129   :  { %v1010_v51 = vrot.slane %v1009_v47, 4 }
 0x12a   :  { %v863_v52 = vadd.f32 %v862_v46, %v861_v0 }
 0x12b   :  { %v1011_v45 = vadd.f32 %v1010_v51, %v1009_v47 }
 0x12c   :  { %v864_v30 = vrot.slane %v863_v52, 1 }
 0x12d   :  { %v1012_v33 = vrot.slane %v1011_v45, 2 }
 0x12e   :  { %v865_v10 = vadd.f32 %v864_v30, %v863_v52 }
 0x12f   :  { %v1013_v57 = vadd.f32 %v1012_v33, %v1011_v45 }
 0x130   :  { %867 = vst.msk [vmem:[%s1603_s3] sm:$0x1] %vm866_vm3, %v865_v10 }
 0x131   :  { %v1014_v59 = vrot.slane %v1013_v57, 1 }
 0x133   :  { %v1015_v34 = vadd.f32 %v1014_v59, %v1013_v57 }
 0x135   :  { %1016 = vst.msk [vmem:[%s1603_s3 + $0x1] sm:$0x1] %vm866_vm3, %v1015_v34 }

</bundles_post_ra>
